<compile_context>
chip_gen: v7x
topology: tpu7x:2x2x1
jax: 0.10.0
libtpu: 0.0.40
codegen_flags: <defaults>
</compile_context>

<pallas_src>
import jax
import jax.numpy as jnp
from jax.experimental import pallas as pl
from jax.experimental.pallas import tpu as pltpu


def _normalize_kernel(x_ref, sb_ref, out_ref):
    # x_ref:  (R, L) tile of the flattened (B*C, H*W) image.
    # sb_ref: (R, 2) f32 per-row [scale, bias] columns (broadcast along lanes).
    x = x_ref[...].astype(jnp.float32)
    scale = sb_ref[:, 0:1]
    bias = sb_ref[:, 1:2]
    out_ref[...] = (x * scale + bias).astype(out_ref.dtype)


def _choose_blocks(n_rows, n_lanes, itemsize, target_bytes, *,
                   min_blocks=8, single_block_bytes=1 << 20,
                   tile_floor_bytes=1 << 20):
    """Pick a legal (row_block, lane_block) that is lane-dense, ~MiB-sized and
    leaves enough grid steps to shard across TensorCores."""
    sublane = max(8, 32 // max(1, itemsize))        # f32:8, bf16:16, i8:32
    total_bytes = n_rows * n_lanes * itemsize

    # Tiny input: one block / one grid step; splitting would be pure overhead.
    if total_bytes <= single_block_bytes:
        return n_rows, n_lanes

    # Cap the tile so the grid has >= min_blocks steps (v7x: 2 TCs, >= 4 each),
    # but never shrink below ~1 MiB (keeps us near the HBM roofline per tile).
    tile_cap = min(target_bytes, -(-total_bytes // min_blocks))
    tile_cap = max(tile_cap, tile_floor_bytes, sublane * 128 * itemsize)

    row_bytes = n_lanes * itemsize
    rows_fit = tile_cap // max(1, row_bytes)

    if rows_fit >= sublane:
        # Full rows: take as many as fit, rounded down to a sublane multiple.
        r_block = min(n_rows, (rows_fit // sublane) * sublane)
        return r_block, n_lanes

    # Individual rows are huge (large H*W, small B*C): split the lane dim too.
    # A 128-multiple l_block is legal even if H*W isn't a multiple of 128;
    # the final partial block is handled by Pallas.
    r_block = min(n_rows, sublane)
    lanes_fit = tile_cap // max(1, r_block * itemsize)
    l_block = min(n_lanes, max(128, (lanes_fit // 128) * 128))
    return r_block, l_block


def normalization_forward(img, mean, std, *, target_tile_bytes=4 << 20):
    """(img - mean[:, None, None]) / std[:, None, None] for NCHW img."""
    B, C, H, W = img.shape
    assert jnp.issubdtype(img.dtype, jnp.floating), (
        "Normalization kernel expects a floating-point image")
    mean = jnp.asarray(mean, dtype=jnp.float32).reshape(-1)
    std = jnp.asarray(std, dtype=jnp.float32).reshape(-1)
    assert mean.shape == (C,) and std.shape == (C,)

    N = B * C
    L = H * W
    x2d = img.reshape(N, L)                         # free view of contiguous NCHW

    # Fused per-channel affine, replicated per batch -> one [scale, bias] per row.
    scale = 1.0 / std                               # (C,)
    bias = -mean / std                              # (C,)
    sb = jnp.stack([jnp.tile(scale, B), jnp.tile(bias, B)], axis=-1)  # (N, 2) f32

    itemsize = jnp.dtype(img.dtype).itemsize
    r_block, l_block = _choose_blocks(N, L, itemsize, target_tile_bytes)
    grid = (pl.cdiv(N, r_block), pl.cdiv(L, l_block))

    # VMEM budget from the actual footprint: double-buffered input + output
    # tiles, the tiny scale/bias column, plus slack.  Clamp to <= 32 MiB so it
    # is always safe on v7x's 64 MiB VMEM (and trivially on v5e/v6e's 128 MiB).
    tile_bytes = r_block * l_block * itemsize
    vmem_limit = 4 * tile_bytes + 4 * (r_block * 2 * 4) + (2 << 20)
    vmem_limit = int(min(32 << 20, max(16 << 20, vmem_limit)))

    out2d = pl.pallas_call(
        _normalize_kernel,
        out_shape=jax.ShapeDtypeStruct((N, L), img.dtype),
        grid=grid,
        in_specs=[
            pl.BlockSpec((r_block, l_block), lambda i, j: (i, j)),
            pl.BlockSpec((r_block, 2), lambda i, j: (i, 0)),
        ],
        out_specs=pl.BlockSpec((r_block, l_block), lambda i, j: (i, j)),
        compiler_params=pltpu.CompilerParams(
            dimension_semantics=("parallel", "parallel"),
            vmem_limit_bytes=vmem_limit,
        ),
    )(x2d, sb)

    return out2d.reshape(B, C, H, W)


if __name__ == "__main__":
    # Deterministic parameters, shapes match nn.Module.__init__: (C,1,1).
    mean = jnp.array([0.485, 0.456, 0.406, 0.5], dtype=jnp.float32)
    std = jnp.array([0.229, 0.224, 0.225, 0.25], dtype=jnp.float32)

    key = jax.random.PRNGKey(0)

    # Small shape consistent with the module (single-block fast path).
    img_small = jax.random.uniform(key, (2, 4, 16, 16), dtype=jnp.float32)
    out_small = jax.block_until_ready(normalization_forward(img_small, mean, std))
    ref_small = (img_small - mean[:, None, None]) / std[:, None, None]
    assert jnp.allclose(out_small, ref_small, atol=1e-5, rtol=1e-5), "small mismatch"

    # Slightly larger image to exercise the multi-block (lane-split, partial
    # last block, parallel grid) path.
    img_big = jax.random.uniform(jax.random.PRNGKey(0), (2, 4, 192, 192),
                                 dtype=jnp.float32)
    out_big = jax.block_until_ready(normalization_forward(img_big, mean, std))
    ref_big = (img_big - mean[:, None, None]) / std[:, None, None]
    assert jnp.allclose(out_big, ref_big, atol=1e-5, rtol=1e-5), "big mismatch"

    print("KERNEL_OK")
</pallas_src>

<mosaic_0001>
module attributes {stable_mosaic.version = 11 : i64} {
  func.func @_normalize_kernel(%arg0: i32, %arg1: i32, %arg2: memref<8x256xf32, #tpu.memory_space<vmem>>, %arg3: memref<8x2xf32, #tpu.memory_space<vmem>>, %arg4: memref<8x256xf32, #tpu.memory_space<vmem>>) attributes {dimension_semantics = [#tpu.dimension_semantics<parallel>, #tpu.dimension_semantics<parallel>], iteration_bounds = array<i64: 1, 1>, scalar_prefetch = 0 : i64, scratch_operands = 0 : i64, tpu.core_type = #tpu.core_type<tc>, window_params = [{transform_indices = @transform_0, window_bounds = array<i64: 8, 256>}, {transform_indices = @transform_1, window_bounds = array<i64: 8, 2>}, {transform_indices = @transform_2, window_bounds = array<i64: 8, 256>}]} {
    %c0 = arith.constant 0 : index
    %c0_0 = arith.constant 0 : index
    %0 = vector.load %arg2[%c0, %c0_0] : memref<8x256xf32, #tpu.memory_space<vmem>>, vector<8x256xf32>
    %c0_1 = arith.constant 0 : index
    %c0_2 = arith.constant 0 : index
    %1 = vector.load %arg3[%c0_1, %c0_2] : memref<8x2xf32, #tpu.memory_space<vmem>>, vector<8x1xf32>
    %c0_3 = arith.constant 0 : index
    %c1 = arith.constant 1 : index
    %2 = vector.load %arg3[%c0_3, %c1] : memref<8x2xf32, #tpu.memory_space<vmem>>, vector<8x1xf32>
    %3 = vector.broadcast %1 : vector<8x1xf32> to vector<8x256xf32>
    %4 = arith.mulf %0, %3 : vector<8x256xf32>
    %5 = vector.broadcast %2 : vector<8x1xf32> to vector<8x256xf32>
    %6 = arith.addf %4, %5 : vector<8x256xf32>
    %c0_4 = arith.constant 0 : index
    %c0_5 = arith.constant 0 : index
    %7 = vector.load %arg4[%c0_4, %c0_5] : memref<8x256xf32, #tpu.memory_space<vmem>>, vector<8x256xf32>
    tpu.vector_store %arg4[%c0_4, %c0_5], %6 {strides = array<i32>} : memref<8x256xf32, #tpu.memory_space<vmem>>, vector<8x256xf32>,
    return
  }
  func.func @transform_0(%arg0: i32, %arg1: i32) -> (i32, i32) {
    %c0_i32 = arith.constant 0 : i32
    return %arg0, %arg1 : i32, i32
  }
  func.func @transform_1(%arg0: i32, %arg1: i32) -> (i32, i32) {
    %c0_i32 = arith.constant 0 : i32
    %c0_i32_0 = arith.constant 0 : i32
    return %arg0, %c0_i32 : i32, i32
  }
  func.func @transform_2(%arg0: i32, %arg1: i32) -> (i32, i32) {
    %c0_i32 = arith.constant 0 : i32
    return %arg0, %arg1 : i32, i32
  }
}

</mosaic_0001>

<bundles_post_ra>
// kernel: tpu_custom_call.1
= control target key start
LH: loop header
LB: loop body
LE: loop exit
PB: predicated region body
PF: predicated region fallthrough
CT: control target
= control target key end

     0   :  { %7 = vsyncpa [#allocation3], 0  ;;  %s157_s0 = inlined_call_operand.hbm [shape: f32[8,256], index: 0, kind: input, shape index: {}]   ;;  %s158_s1 = inlined_call_operand.vmem [shape: f32[8,2], index: 1, kind: input, shape index: {}]   ;;  %s159_s2 = inlined_call_operand.hbm [shape: f32[8,256], index: 2, kind: output, shape index: {}]  }
   0x1   :  { %8 = vsyncpa [#allocation4], 0  ;;  %s111_s9 = smov [#allocation2]   ;;  %s63_s13 = scalar_lea.hbm %s157_s0, 256 }
   0x2   :  { %s15_s10 = sshll.u32 %s111_s9, 4  ;;  %p64_p0 = scmp.ne.s32.totalorder %s157_s0, %s63_s13  ;;  %s16_s10 = int_to_ptr.vmem [resolvable:$true] %s15_s10 }
   0x3   :  { %p67_p1 = scmp.lt.u32.totalorder %s63_s13, %s157_s0 }
   0x5   :  { %p69_p2 = pnand %p67_p1, %p64_p0 }
   0x7   :  { %72 = shalt.err (!%p69_p2)
}
   0x8   :  { %s73_s18 = scalar_lea.vmem %s16_s10, 256  ;;  %p78_p4 = scmp.lt.s32.totalorder %s16_s10, %s16_s10 }
   0x9   :  { %p74_p3 = scmp.ne.s32.totalorder %s16_s10, %s73_s18  ;;  %p79_p5 = scmp.lt.s32.totalorder %s73_s18, %s73_s18 }
   0xb   :  { %p80_p6 = por %p79_p5, %p78_p4 }
   0xd   :  { %p81_p7 = pnand %p80_p6, %p74_p3 }
   0xf   :  { %84 = shalt.err (!%p81_p7)
}
  0x10   :  { %18 = dma.hbm_to_vmem [thread:$0]  %s157_s0, 256, %s16_s10, [#allocation3]  }
  0x11   :  { %107 = dma.done.wait [#allocation3], 256  }
  0x12   :  { %108 = vsyncadd [#allocation3], 4294967040  ;;  %v112_v0 = vmov 0   ;;  %v26_v1 = vld [vmem:[%s158_s1] sm:$0xff]  ;;  %v113_v2 = vmov 1   ;;  %v25_v5 = vld [vmem:[#allocation2 + $0x8] sm:$0xff] }
  0x13   :  { %61 = vset.pattern.permute.xlu0 %v112_v0  ;;  %v24_v4 = vld [vmem:[#allocation2] sm:$0xff]  ;;  %s114_s23 = smov [#allocation5]  }
  0x14   :  { %29 = vperm.xlu0 %61, %v26_v1   ;;  %s48_s24 = sshll.u32 %s114_s23, 4  ;;  %s49_s24 = int_to_ptr.vmem [resolvable:$true] %s48_s24 }
  0x15   :  { %s85_s0 = scalar_lea.vmem %s49_s24, 256  ;;  %p90_p9 = scmp.lt.s32.totalorder %s49_s24, %s49_s24 }
  0x16   :  { %p86_p8 = scmp.ne.s32.totalorder %s49_s24, %s85_s0  ;;  %p91_p10 = scmp.lt.s32.totalorder %s85_s0, %s85_s0 }
  0x18   :  { %62 = vset.pattern.permute.xlu0 %v113_v2  ;;  %p92_p11 = por %p91_p10, %p90_p9 }
  0x19   :  { %35 = vperm.xlu0 %62, %v26_v1  }
  0x1a   :  { %p93_p12 = pnand %p92_p11, %p86_p8 }
  0x93   :  { %v30_v3 = vpop.permute.xlu0 %29 }
  0x94   :  { %v32_v6 = vmul.f32 %v30_v3, %v24_v4  ;;  %v33_v7 = vmul.f32 %v30_v3, %v25_v5 }
  0x98   :  { %v36_v8 = vpop.permute.xlu0 %35 }
  0x99   :  { %v38_v9 = vadd.f32 %v36_v8, %v32_v6  ;;  %v39_v10 = vadd.f32 %v36_v8, %v33_v7 }
  0x9b   :  { %40 = vst [vmem:[#allocation5] sm:$0xff] %v38_v9  ;;  %41 = vst [vmem:[#allocation5 + $0x8] sm:$0xff] %v39_v10 }
  0x9c   :  { %96 = shalt.err (!%p93_p12)
}
  0x9d   :  { %s97_s26 = scalar_lea.hbm %s159_s2, 256 }
  0x9e   :  { %p98_p13 = scmp.ne.s32.totalorder %s159_s2, %s97_s26  ;;  %p101_p0 = scmp.lt.u32.totalorder %s97_s26, %s159_s2 }
  0xa0   :  { %p103_p1 = pnand %p101_p0, %p98_p13 }
  0xa2   :  { %106 = shalt.err (!%p103_p1)
}
  0xa3   :  { %51 = dma.vmem_to_hbm [thread:$0]  %s49_s24, 256, %s159_s2, [#allocation4]  }
  0xa4   :  { %109 = dma.done.wait [#allocation4], 256  }
  0xa5   :  { %110 = vsyncadd [#allocation4], 4294967040 }
  0xa6   :  { %55 = vsyncpa [#allocation3], 1 }
  0xa7   :  { %56 = vsyncpa [#allocation4], 1 }

</bundles_post_ra>
